<compile_context>
chip_gen: v7x
topology: tpu7x:2x2x1
jax: 0.10.0
libtpu: 0.0.40
codegen_flags: <defaults>
</compile_context>

<pallas_src>
import functools

import jax
import jax.numpy as jnp
from jax import lax
from jax.experimental import pallas as pl
from jax.experimental.pallas import tpu as pltpu

_MIB = 1024 * 1024


# ----------------------------- helpers -------------------------------------


def _round_up(x, m):
    return (x + m - 1) // m * m


def _chip_config():
    """Best-effort TPU generation + VMEM capacity detection (trace-time Python)."""
    kind = ""
    try:
        kind = jax.devices()[0].device_kind.lower()
    except Exception:
        pass
    vmem_cap = None
    try:
        vmem_cap = int(pltpu.get_tpu_info().vmem_capacity_bytes)
    except Exception:
        vmem_cap = None

    if "v7" in kind:
        gen = "v7x"
    elif "v6" in kind:
        gen = "v6e"
    elif "v5e" in kind or "v5 lite" in kind or "v5lite" in kind:
        gen = "v5e"
    elif vmem_cap is not None and vmem_cap <= 64 * _MIB:
        gen = "v7x"
    else:
        gen = "unknown"

    if vmem_cap is None:
        vmem_cap = 64 * _MIB if gen == "v7x" else 128 * _MIB
    return gen, vmem_cap


def _select_tiles(T, H, F, itemsize, gen, vmem_cap):
    """Generation-aware (tm, tf, vmem_limit_bytes).

    The token tile must be large enough that arithmetic intensity vs. streamed expert
    weights clears the per-chip roofline knee (v6e ~650 FLOP/B -> tm~1024,
    v7x ~300-350 FLOP/B -> tm~512, v5e ~240 FLOP/B -> tm=256), while the
    double-buffered working set stays inside the per-chip VMEM budget.
    """
    if gen == "v6e":
        tm_target, tf_target = 1024, 512
        vmem_limit = min(100 * _MIB, vmem_cap - 16 * _MIB)
    elif gen == "v7x":
        tm_target, tf_target = 512, 256
        vmem_limit = min(56 * _MIB, vmem_cap - 8 * _MIB)
    elif gen == "v5e":
        tm_target, tf_target = 256, 512
        vmem_limit = min(64 * _MIB, vmem_cap - 16 * _MIB)
    else:  # conservative default that fits any generation
        tm_target, tf_target = 512, 256
        vmem_limit = min(56 * _MIB, vmem_cap - 8 * _MIB)
    vmem_limit = max(vmem_limit, 32 * _MIB)

    tm = min(tm_target, _round_up(T, 8))

    # v7x shards the "parallel" token-tile axis across its 2 TensorCores: keep
    # num_i >= 2 when there is enough work to split.
    if gen == "v7x" and T > 256 and _round_up(T, tm) // tm < 2:
        tm = _round_up((T + 1) // 2, 8)

    def _pick_tf():
        for t in (tf_target, 512, 256, 128):
            if t <= tf_target and F > t and F % t == 0:
                return t
        return F

    tf = _pick_tf()

    def _vmem_bytes(tm_, tf_):
        xo = 2 * 2 * tm_ * H * itemsize      # double-buffered x tile + out tile
        acc = tm_ * H * 4                    # f32 accumulator scratch
        w = 2 * 3 * tf_ * H * itemsize       # double-buffered w1/w3/w2 chunks
        rw = 2 * tm_ * itemsize              # routing-weight column
        return xo + acc + w + rw

    # Shrink until the tile set fits the budget (leaves headroom for compiler scratch).
    while _vmem_bytes(tm, tf) > 0.9 * vmem_limit:
        if tf > 256 and F % (tf // 2) == 0:
            tf //= 2
        elif tm > 256:
            tm = _round_up(tm // 2, 8)
        else:
            break

    return tm, tf, int(vmem_limit)


# ----------------------------- Pallas kernel -------------------------------


def _moe_kernel(act_ref, we_ref,                        # scalar prefetch (SMEM)
                x_ref, w1_ref, w3_ref, w2_ref, rw_ref,  # tiled inputs (VMEM)
                out_ref,                                # output (VMEM)
                acc_ref):                               # scratch (VMEM f32)
    """Grid = (token_tile i [parallel], expert e [arbitrary], ffn chunk f [arbitrary]).

    x_ref  : (tm, H)      token tile (resident across e, f)
    w1_ref : (1, tf, H)   w1 chunk of expert e   (torch layout, contract over H)
    w3_ref : (1, tf, H)   w3 chunk of expert e
    w2_ref : (1, H, tf)   w2 chunk of expert e   (contract over the ffn chunk)
    rw_ref : (1, tm, 1)   per-token routing weight for expert e (0 if unrouted)
    out_ref: (tm, H)      written at the last (e, f) step of each token tile
    acc_ref: (tm, H) f32  accumulator
    """
    i = pl.program_id(0)
    e = pl.program_id(1)
    f = pl.program_id(2)
    ne = pl.num_programs(1)
    nf = pl.num_programs(2)

    @pl.when((e == 0) & (f == 0))
    def _():
        acc_ref[...] = jnp.zeros_like(acc_ref)

    # Skip experts that no token in this tile routes to (weights for these steps are
    # also not re-fetched -- the index_maps freeze the block index).
    @pl.when(act_ref[i, e] > 0)
    def _():
        x = x_ref[...]                                                   # (tm, H)
        mm1 = lax.dot_general(x, w1_ref[0], (((1,), (1,)), ((), ())),
                              preferred_element_type=jnp.float32)        # (tm, tf)
        mm3 = lax.dot_general(x, w3_ref[0], (((1,), (1,)), ((), ())),
                              preferred_element_type=jnp.float32)        # (tm, tf)
        inter = (mm1 * jax.nn.sigmoid(mm1)) * mm3                        # silu(mm1)*mm3
        rw = rw_ref[0].astype(jnp.float32)                               # (tm, 1)
        inter = inter * rw                                               # fold routing wt
        contrib = lax.dot_general(inter.astype(x.dtype), w2_ref[0],
                                  (((1,), (1,)), ((), ())),
                                  preferred_element_type=jnp.float32)    # (tm, H)
        acc_ref[...] += contrib

    @pl.when((e == ne - 1) & (f == nf - 1))
    def _():
        out_ref[...] = acc_ref[...].astype(out_ref.dtype)


# --------------------------- decode / tiny-T fast path ----------------------


def _xla_moe(x2d, rw_dense, group_w1_w3, group_w2, F):
    """Dense-over-experts XLA path for small token counts (kernel grid overhead
    dominates there)."""
    h = jnp.einsum("th,efh->tef", x2d, group_w1_w3,
                   preferred_element_type=jnp.float32)                   # (T, E, 2F)
    mm1, mm3 = h[..., :F], h[..., F:]
    inter = (mm1 * jax.nn.sigmoid(mm1)) * mm3
    inter = inter * rw_dense.astype(jnp.float32)[:, :, None]
    out = jnp.einsum("tef,ehf->th", inter.astype(x2d.dtype), group_w2,
                     preferred_element_type=jnp.float32)                 # (T, H)
    return out.astype(x2d.dtype)


# ------------------------------ JAX wrapper --------------------------------


@functools.partial(jax.jit, static_argnames=("top_k", "force_path"))
def mixtral_sparse_moe_block(hidden_states, gate_w, group_w1_w3, group_w2,
                             top_k=2, force_path=None):
    """force_path: None (auto), "kernel", or "xla"."""
    B, S, H = hidden_states.shape
    T = B * S
    E, F2, _ = group_w1_w3.shape
    F = F2 // 2
    dtype = hidden_states.dtype

    x2d = hidden_states.reshape(T, H)

    # ---- router + routing weights (plain JAX; tiny N=E GEMM + data-dependent top-k) ----
    # TODO(synk): top-k + scatter of routing weights is data-dependent; kept in XLA.
    router_logits = jnp.dot(x2d, gate_w.T)
    routing = jax.nn.softmax(router_logits.astype(jnp.float32), axis=-1)
    rw, sel = lax.top_k(routing, top_k)
    rw = rw / jnp.sum(rw, axis=-1, keepdims=True)
    rw = rw.astype(dtype)
    # Dense (T, E) routing-weight matrix: 0 for unselected experts.
    rw_dense = jnp.zeros((T, E), dtype).at[jnp.arange(T)[:, None], sel].add(rw)

    use_kernel = (force_path == "kernel") or (force_path is None and T >= 64)
    if force_path == "xla":
        use_kernel = False
    if not use_kernel:
        out = _xla_moe(x2d, rw_dense, group_w1_w3, group_w2, F)
        return out.reshape(B, S, H), router_logits

    # ---- generation-aware tile sizes & VMEM budget ----
    gen, vmem_cap = _chip_config()
    tm, tf, vmem_limit = _select_tiles(T, H, F, jnp.dtype(dtype).itemsize, gen, vmem_cap)
    T_pad = _round_up(T, tm)
    num_i = T_pad // tm
    nf = F // tf

    if T_pad != T:
        x_p = jnp.pad(x2d, ((0, T_pad - T), (0, 0)))
        rw_p = jnp.pad(rw_dense, ((0, T_pad - T), (0, 0)))
    else:
        x_p, rw_p = x2d, rw_dense

    rw_t = jnp.transpose(rw_p)[:, :, None]                      # (E, T_pad, 1)

    # Per-(token tile, expert) activity, plus the "carried" expert block index: for
    # inactive (tile, expert) rows the weight index_maps return the previously fetched
    # block, so consecutive identical indices elide the DMA entirely.
    active = (rw_p.reshape(num_i, tm, E) > 0).any(axis=1)        # (num_i, E) bool
    active_i32 = active.astype(jnp.int32)
    flat = active.reshape(-1)
    pos = jnp.arange(num_i * E, dtype=jnp.int32)
    last_pos = lax.cummax(jnp.where(flat, pos, -1), axis=0)
    we_i32 = jnp.where(last_pos >= 0, last_pos % E, 0).astype(jnp.int32).reshape(num_i, E)

    # ---- index maps (scalar-prefetch refs arrive as trailing positional args) ----
    def x_map(i, e, f, act, we):
        return (i, 0)

    def w1_map(i, e, f, act, we):
        a = act[i, e]
        return (we[i, e], f * a + (nf - 1) * (1 - a), 0)

    def w3_map(i, e, f, act, we):
        a = act[i, e]
        return (we[i, e], (f + nf) * a + (2 * nf - 1) * (1 - a), 0)

    def w2_map(i, e, f, act, we):
        a = act[i, e]
        return (we[i, e], 0, f * a + (nf - 1) * (1 - a))

    def rw_map(i, e, f, act, we):
        return (we[i, e], i, 0)

    def out_map(i, e, f, act, we):
        return (i, 0)

    grid_spec = pltpu.PrefetchScalarGridSpec(
        num_scalar_prefetch=2,
        grid=(num_i, E, nf),
        in_specs=[
            pl.BlockSpec((tm, H), x_map),          # token tile (resident across e, f)
            pl.BlockSpec((1, tf, H), w1_map),      # w1 chunk (torch layout)
            pl.BlockSpec((1, tf, H), w3_map),      # w3 chunk (same array, offset nf)
            pl.BlockSpec((1, H, tf), w2_map),      # w2 chunk (torch layout)
            pl.BlockSpec((1, tm, 1), rw_map),      # routing weights of expert e
        ],
        out_specs=pl.BlockSpec((tm, H), out_map),
        scratch_shapes=[pltpu.VMEM((tm, H), jnp.float32)],
    )

    out_p = pl.pallas_call(
        _moe_kernel,
        out_shape=jax.ShapeDtypeStruct((T_pad, H), dtype),
        grid_spec=grid_spec,
        compiler_params=pltpu.CompilerParams(
            dimension_semantics=("parallel", "arbitrary", "arbitrary"),
            vmem_limit_bytes=vmem_limit,
        ),
    )(active_i32, we_i32, x_p, group_w1_w3, group_w1_w3, group_w2, rw_t)

    final = out_p[:T].reshape(B, S, H)
    return final, router_logits


# ------------------------------ pure-JAX reference --------------------------


def ref_moe(hidden_states, gate_w, group_w1_w3, group_w2, top_k=2):
    B, S, H = hidden_states.shape
    x = hidden_states.reshape(-1, H)
    E = gate_w.shape[0]
    logits = x @ gate_w.T
    routing = jax.nn.softmax(logits.astype(jnp.float32), axis=-1)
    rw, sel = jax.lax.top_k(routing, top_k)
    rw = rw / jnp.sum(rw, axis=-1, keepdims=True)
    rw = rw.astype(x.dtype)
    out = jnp.zeros_like(x)
    for e in range(E):
        h = x @ group_w1_w3[e].T
        f = h.shape[-1] // 2
        inter = jax.nn.silu(h[:, :f]) * h[:, f:]
        oe = inter @ group_w2[e].T
        w_e = jnp.where(sel == e, rw, 0.0).sum(-1)
        out = out + oe * w_e[:, None]
    return out.reshape(B, S, H), logits


# ----------------------------------- main -----------------------------------

if __name__ == "__main__":
    # Small, forward-consistent shapes.
    batch, seq = 2, 8
    hidden_dim = 32       # config.hidden_size
    ffn_dim = 64          # config.intermediate_size
    num_experts = 8       # config.num_local_experts
    top_k = 2             # config.num_experts_per_tok

    key = jax.random.PRNGKey(0)
    k_x, k_gate, k_w13, k_w2 = jax.random.split(key, 4)

    hidden_states = jax.random.normal(k_x, (batch, seq, hidden_dim), jnp.float32)
    gate_w = jax.random.normal(k_gate, (num_experts, hidden_dim), jnp.float32) * 0.1
    group_w1_w3 = (
        jax.random.normal(k_w13, (num_experts, 2 * ffn_dim, hidden_dim), jnp.float32)
        * 0.05
    )
    group_w2 = (
        jax.random.normal(k_w2, (num_experts, hidden_dim, ffn_dim), jnp.float32) * 0.05
    )

    # Pallas kernel path (forced; the auto path would use the tiny-T XLA fast path).
    out, logits = mixtral_sparse_moe_block(
        hidden_states, gate_w, group_w1_w3, group_w2, top_k=top_k, force_path="kernel"
    )
    out = jax.block_until_ready(out)
    logits = jax.block_until_ready(logits)

    # Decode / small-T fast path (auto-selected for T=16).
    out_fast, logits_fast = mixtral_sparse_moe_block(
        hidden_states, gate_w, group_w1_w3, group_w2, top_k=top_k
    )
    out_fast = jax.block_until_ready(out_fast)

    ref_out, ref_logits = ref_moe(
        hidden_states, gate_w, group_w1_w3, group_w2, top_k=top_k
    )

    assert out.shape == (batch, seq, hidden_dim)
    assert logits.shape == (batch * seq, num_experts)
    # Loose-ish tolerances: kernel accumulates in f32 on the MXU while the XLA
    # reference uses default TPU matmul precision.
    assert jnp.allclose(out, ref_out, atol=2e-3, rtol=5e-2), (
        float(jnp.max(jnp.abs(out - ref_out))))
    assert jnp.allclose(out_fast, ref_out, atol=2e-3, rtol=5e-2), (
        float(jnp.max(jnp.abs(out_fast - ref_out))))
    assert jnp.allclose(logits, ref_logits, atol=1e-4, rtol=1e-4)

    print("KERNEL_OK")
</pallas_src>

<mosaic_0001>
module attributes {stable_mosaic.version = 11 : i64} {
  func.func private @main(%arg0: i32) attributes {dimension_semantics = [#tpu.dimension_semantics<core_parallel>], iteration_bounds = array<i64: 2>, tpu.core_type = #tpu.core_type<sc_scalar_subcore>, window_params = []} {
    return
  }
}

module attributes {stable_mosaic.version = 11 : i64} {
  func.func private @main(%arg0: i32) attributes {dimension_semantics = [#tpu.dimension_semantics<core_parallel>], iteration_bounds = array<i64: 2>, tpu.core_type = #tpu.core_type<sc_scalar_subcore>, window_params = []} {
    return
  }
}

module attributes {stable_mosaic.version = 11 : i64} {
  func.func @_moe_kernel(%arg0: i32, %arg1: i32, %arg2: i32, %arg3: memref<1x8xi32, #tpu.memory_space<smem>>, %arg4: memref<1x8xi32, #tpu.memory_space<smem>>, %arg5: memref<16x32xf32, #tpu.memory_space<vmem>>, %arg6: memref<1x64x32xf32, #tpu.memory_space<vmem>>, %arg7: memref<1x64x32xf32, #tpu.memory_space<vmem>>, %arg8: memref<1x32x64xf32, #tpu.memory_space<vmem>>, %arg9: memref<1x16x1xf32, #tpu.memory_space<vmem>>, %arg10: memref<16x32xf32, #tpu.memory_space<vmem>>, %arg11: memref<16x32xf32, #tpu.memory_space<vmem>>) attributes {dimension_semantics = [#tpu.dimension_semantics<parallel>, #tpu.dimension_semantics<arbitrary>, #tpu.dimension_semantics<arbitrary>], iteration_bounds = array<i64: 1, 8, 1>, scalar_prefetch = 2 : i64, scratch_operands = 1 : i64, tpu.core_type = #tpu.core_type<tc>, window_params = [{transform_indices = @transform_0, window_bounds = array<i64: 16, 32>}, {transform_indices = @transform_1, window_bounds = array<i64: 1, 64, 32>}, {transform_indices = @transform_2, window_bounds = array<i64: 1, 64, 32>}, {transform_indices = @transform_3, window_bounds = array<i64: 1, 32, 64>}, {transform_indices = @transform_4, window_bounds = array<i64: 1, 16, 1>}, {transform_indices = @transform_5, window_bounds = array<i64: 16, 32>}]} {
    %c0_i32 = arith.constant 0 : i32
    %0 = arith.cmpi eq, %arg1, %c0_i32 : i32
    %c0_i32_0 = arith.constant 0 : i32
    %1 = arith.cmpi eq, %arg2, %c0_i32_0 : i32
    %2 = arith.andi %0, %1 : i1
    %3 = arith.extui %2 : i1 to i32
    %c0_i32_1 = arith.constant 0 : i32
    %4 = arith.cmpi ne, %3, %c0_i32_1 : i32
    scf.if %4 {
      %cst = arith.constant 0.000000e+00 : f32
      %16 = vector.broadcast %cst : f32 to vector<16x32xf32>
      %c0 = arith.constant 0 : index
      %c0_6 = arith.constant 0 : index
      %17 = vector.load %arg11[%c0, %c0_6] : memref<16x32xf32, #tpu.memory_space<vmem>>, vector<16x32xf32>
      tpu.vector_store %arg11[%c0, %c0_6], %16 {strides = array<i32>} : memref<16x32xf32, #tpu.memory_space<vmem>>, vector<16x32xf32>,
    } else {
    }
    %5 = arith.index_cast %arg0 : i32 to index
    %6 = arith.index_cast %arg1 : i32 to index
    %7 = memref.load %arg3[%5, %6] : memref<1x8xi32, #tpu.memory_space<smem>>
    %c0_i32_2 = arith.constant 0 : i32
    %8 = arith.cmpi sgt, %7, %c0_i32_2 : i32
    %9 = arith.extui %8 : i1 to i32
    %c0_i32_3 = arith.constant 0 : i32
    %10 = arith.cmpi ne, %9, %c0_i32_3 : i32
    scf.if %10 {
      %c0 = arith.constant 0 : index
      %c0_6 = arith.constant 0 : index
      %16 = vector.load %arg5[%c0, %c0_6] : memref<16x32xf32, #tpu.memory_space<vmem>>, vector<16x32xf32>
      %c0_7 = arith.constant 0 : index
      %c0_8 = arith.constant 0 : index
      %c0_9 = arith.constant 0 : index
      %17 = vector.load %arg6[%c0_7, %c0_8, %c0_9] : memref<1x64x32xf32, #tpu.memory_space<vmem>>, vector<1x64x32xf32>
      %18 = vector.shape_cast %17 : vector<1x64x32xf32> to vector<64x32xf32>
      %cst = arith.constant dense<0.000000e+00> : vector<16x64xf32>
      %19 = tpu.matmul %16, %18, %cst {dimension_numbers = #tpu.dot_dimension_numbers<[1], [1], [0], [0], [0, 0, 1, 0], [], []>} : vector<16x32xf32>, vector<64x32xf32>, vector<16x64xf32> -> vector<16x64xf32>
      %c0_10 = arith.constant 0 : index
      %c0_11 = arith.constant 0 : index
      %c0_12 = arith.constant 0 : index
      %20 = vector.load %arg7[%c0_10, %c0_11, %c0_12] : memref<1x64x32xf32, #tpu.memory_space<vmem>>, vector<1x64x32xf32>
      %21 = vector.shape_cast %20 : vector<1x64x32xf32> to vector<64x32xf32>
      %cst_13 = arith.constant dense<0.000000e+00> : vector<16x64xf32>
      %22 = tpu.matmul %16, %21, %cst_13 {dimension_numbers = #tpu.dot_dimension_numbers<[1], [1], [0], [0], [0, 0, 1, 0], [], []>} : vector<16x32xf32>, vector<64x32xf32>, vector<16x64xf32> -> vector<16x64xf32>
      %23 = arith.negf %19 : vector<16x64xf32>
      %24 = math.exp %23 : vector<16x64xf32>
      %cst_14 = arith.constant 1.000000e+00 : f32
      %25 = vector.broadcast %cst_14 : f32 to vector<16x64xf32>
      %26 = arith.addf %25, %24 : vector<16x64xf32>
      %27 = arith.divf %25, %26 : vector<16x64xf32>
      %28 = arith.mulf %19, %27 : vector<16x64xf32>
      %29 = arith.mulf %28, %22 : vector<16x64xf32>
      %c0_15 = arith.constant 0 : index
      %c0_16 = arith.constant 0 : index
      %c0_17 = arith.constant 0 : index
      %30 = vector.load %arg9[%c0_15, %c0_16, %c0_17] : memref<1x16x1xf32, #tpu.memory_space<vmem>>, vector<1x16x1xf32>
      %31 = vector.shape_cast %30 : vector<1x16x1xf32> to vector<16x1xf32>
      %32 = vector.broadcast %31 : vector<16x1xf32> to vector<16x64xf32>
      %33 = arith.mulf %29, %32 : vector<16x64xf32>
      %c0_18 = arith.constant 0 : index
      %c0_19 = arith.constant 0 : index
      %c0_20 = arith.constant 0 : index
      %34 = vector.load %arg8[%c0_18, %c0_19, %c0_20] : memref<1x32x64xf32, #tpu.memory_space<vmem>>, vector<1x32x64xf32>
      %35 = vector.shape_cast %34 : vector<1x32x64xf32> to vector<32x64xf32>
      %cst_21 = arith.constant dense<0.000000e+00> : vector<16x32xf32>
      %36 = tpu.matmul %33, %35, %cst_21 {dimension_numbers = #tpu.dot_dimension_numbers<[1], [1], [0], [0], [0, 0, 1, 0], [], []>} : vector<16x64xf32>, vector<32x64xf32>, vector<16x32xf32> -> vector<16x32xf32>
      %c0_22 = arith.constant 0 : index
      %c0_23 = arith.constant 0 : index
      %37 = vector.load %arg11[%c0_22, %c0_23] : memref<16x32xf32, #tpu.memory_space<vmem>>, vector<16x32xf32>
      %38 = arith.addf %37, %36 : vector<16x32xf32>
      %c0_24 = arith.constant 0 : index
      %c0_25 = arith.constant 0 : index
      %39 = vector.load %arg11[%c0_24, %c0_25] : memref<16x32xf32, #tpu.memory_space<vmem>>, vector<16x32xf32>
      tpu.vector_store %arg11[%c0_24, %c0_25], %38 {strides = array<i32>} : memref<16x32xf32, #tpu.memory_space<vmem>>, vector<16x32xf32>,
    } else {
    }
    %c7_i32 = arith.constant 7 : i32
    %11 = arith.cmpi eq, %arg1, %c7_i32 : i32
    %c0_i32_4 = arith.constant 0 : i32
    %12 = arith.cmpi eq, %arg2, %c0_i32_4 : i32
    %13 = arith.andi %11, %12 : i1
    %14 = arith.extui %13 : i1 to i32
    %c0_i32_5 = arith.constant 0 : i32
    %15 = arith.cmpi ne, %14, %c0_i32_5 : i32
    scf.if %15 {
      %c0 = arith.constant 0 : index
      %c0_6 = arith.constant 0 : index
      %16 = vector.load %arg11[%c0, %c0_6] : memref<16x32xf32, #tpu.memory_space<vmem>>, vector<16x32xf32>
      %c0_7 = arith.constant 0 : index
      %c0_8 = arith.constant 0 : index
      %17 = vector.load %arg10[%c0_7, %c0_8] : memref<16x32xf32, #tpu.memory_space<vmem>>, vector<16x32xf32>
      tpu.vector_store %arg10[%c0_7, %c0_8], %16 {strides = array<i32>} : memref<16x32xf32, #tpu.memory_space<vmem>>, vector<16x32xf32>,
    } else {
    }
    return
  }
  func.func @transform_0(%arg0: i32, %arg1: i32, %arg2: i32, %arg3: memref<1x8xi32, #tpu.memory_space<smem>>, %arg4: memref<1x8xi32, #tpu.memory_space<smem>>) -> (i32, i32) {
    %c0_i32 = arith.constant 0 : i32
    %c0_i32_0 = arith.constant 0 : i32
    return %arg0, %c0_i32 : i32, i32
  }
  func.func @transform_1(%arg0: i32, %arg1: i32, %arg2: i32, %arg3: memref<1x8xi32, #tpu.memory_space<smem>>, %arg4: memref<1x8xi32, #tpu.memory_space<smem>>) -> (i32, i32, i32) {
    %0 = arith.index_cast %arg0 : i32 to index
    %1 = arith.index_cast %arg1 : i32 to index
    %2 = memref.load %arg3[%0, %1] : memref<1x8xi32, #tpu.memory_space<smem>>
    %3 = arith.index_cast %arg0 : i32 to index
    %4 = arith.index_cast %arg1 : i32 to index
    %5 = memref.load %arg4[%3, %4] : memref<1x8xi32, #tpu.memory_space<smem>>
    %6 = arith.muli %arg2, %2 : i32
    %c1_i32 = arith.constant 1 : i32
    %7 = arith.subi %c1_i32, %2 : i32
    %c0_i32 = arith.constant 0 : i32
    %8 = arith.muli %c0_i32, %7 : i32
    %9 = arith.addi %6, %8 : i32
    %c0_i32_0 = arith.constant 0 : i32
    %c0_i32_1 = arith.constant 0 : i32
    return %5, %9, %c0_i32_0 : i32, i32, i32
  }
  func.func @transform_2(%arg0: i32, %arg1: i32, %arg2: i32, %arg3: memref<1x8xi32, #tpu.memory_space<smem>>, %arg4: memref<1x8xi32, #tpu.memory_space<smem>>) -> (i32, i32, i32) {
    %0 = arith.index_cast %arg0 : i32 to index
    %1 = arith.index_cast %arg1 : i32 to index
    %2 = memref.load %arg3[%0, %1] : memref<1x8xi32, #tpu.memory_space<smem>>
    %3 = arith.index_cast %arg0 : i32 to index
    %4 = arith.index_cast %arg1 : i32 to index
    %5 = memref.load %arg4[%3, %4] : memref<1x8xi32, #tpu.memory_space<smem>>
    %c1_i32 = arith.constant 1 : i32
    %6 = arith.addi %arg2, %c1_i32 : i32
    %7 = arith.muli %6, %2 : i32
    %c1_i32_0 = arith.constant 1 : i32
    %8 = arith.subi %c1_i32_0, %2 : i32
    %c1_i32_1 = arith.constant 1 : i32
    %9 = arith.muli %c1_i32_1, %8 : i32
    %10 = arith.addi %7, %9 : i32
    %c0_i32 = arith.constant 0 : i32
    %c0_i32_2 = arith.constant 0 : i32
    return %5, %10, %c0_i32 : i32, i32, i32
  }
  func.func @transform_3(%arg0: i32, %arg1: i32, %arg2: i32, %arg3: memref<1x8xi32, #tpu.memory_space<smem>>, %arg4: memref<1x8xi32, #tpu.memory_space<smem>>) -> (i32, i32, i32) {
    %0 = arith.index_cast %arg0 : i32 to index
    %1 = arith.index_cast %arg1 : i32 to index
    %2 = memref.load %arg3[%0, %1] : memref<1x8xi32, #tpu.memory_space<smem>>
    %3 = arith.index_cast %arg0 : i32 to index
    %4 = arith.index_cast %arg1 : i32 to index
    %5 = memref.load %arg4[%3, %4] : memref<1x8xi32, #tpu.memory_space<smem>>
    %6 = arith.muli %arg2, %2 : i32
    %c1_i32 = arith.constant 1 : i32
    %7 = arith.subi %c1_i32, %2 : i32
    %c0_i32 = arith.constant 0 : i32
    %8 = arith.muli %c0_i32, %7 : i32
    %9 = arith.addi %6, %8 : i32
    %c0_i32_0 = arith.constant 0 : i32
    %c0_i32_1 = arith.constant 0 : i32
    return %5, %c0_i32_0, %9 : i32, i32, i32
  }
  func.func @transform_4(%arg0: i32, %arg1: i32, %arg2: i32, %arg3: memref<1x8xi32, #tpu.memory_space<smem>>, %arg4: memref<1x8xi32, #tpu.memory_space<smem>>) -> (i32, i32, i32) {
    %0 = arith.index_cast %arg0 : i32 to index
    %1 = arith.index_cast %arg1 : i32 to index
    %2 = memref.load %arg4[%0, %1] : memref<1x8xi32, #tpu.memory_space<smem>>
    %c0_i32 = arith.constant 0 : i32
    %c0_i32_0 = arith.constant 0 : i32
    return %2, %arg0, %c0_i32 : i32, i32, i32
  }
  func.func @transform_5(%arg0: i32, %arg1: i32, %arg2: i32, %arg3: memref<1x8xi32, #tpu.memory_space<smem>>, %arg4: memref<1x8xi32, #tpu.memory_space<smem>>) -> (i32, i32) {
    %c0_i32 = arith.constant 0 : i32
    %c0_i32_0 = arith.constant 0 : i32
    return %arg0, %c0_i32 : i32, i32
  }
}

</mosaic_0001>

<bundles_post_ra>
// kernel: mixtral_sparse_moe_block.1
= control target key start
LH: loop header
LB: loop body
LE: loop exit
PB: predicated region body
PF: predicated region fallthrough
CT: control target
= control target key end

     0   :  { %s1753_s0 = inlined_call_operand.vmem [shape: s32[1,8], index: 0, kind: input, shape index: {}]   ;;  %s1754_s2 = inlined_call_operand.vmem [shape: f32[16,32], index: 2, kind: input, shape index: {}]   ;;  %s1755_s3 = inlined_call_operand.vmem [shape: f32[8,128,32], index: 3, kind: input, shape index: {}, may-alias: {3,4}]   ;;  %s1756_s4 = inlined_call_operand.vmem [shape: f32[8,128,32], index: 4, kind: input, shape index: {}, may-alias: {3,4}]   ;;  %s1757_s5 = inlined_call_operand.vmem [shape: f32[8,32,64], index: 5, kind: input, shape index: {}]   ;;  %s1758_s6 = inlined_call_operand.vmem [shape: f32[8,16,1], index: 6, kind: input, shape index: {}]   ;;  %s1759_s7 = inlined_call_operand.hbm [shape: f32[16,32], index: 7, kind: output, shape index: {}]   ;;  %s1760_s1 = inlined_call_operand.vmem [shape: s32[1,8], index: 1, kind: input, shape index: {}]  }
   0x1   :  { %s12_s26 = sshll.u32 %s1753_s0, 4  ;;  %s16_s29 = sshll.u32 %s1760_s1, 4  ;;  %s13_s26 = int_to_ptr.vmem [resolvable:$true] %s12_s26  ;;  %s17_s29 = int_to_ptr.vmem [resolvable:$true] %s16_s29 }
   0x2   :  { %s1452_s30 = scalar_lea.vmem %s13_s26, 16  ;;  %p1457_p1 = scmp.lt.s32.totalorder %s13_s26, %s13_s26 }
   0x3   :  { %p1453_p0 = scmp.ne.s32.totalorder %s13_s26, %s1452_s30  ;;  %p1458_p2 = scmp.lt.s32.totalorder %s1452_s30, %s1452_s30 }
   0x5   :  { %p1459_p3 = por %p1458_p2, %p1457_p1 }
   0x7   :  { %p1460_p4 = pnand %p1459_p3, %p1453_p0 }
   0x9   :  { %1463 = shalt.err (!%p1460_p4)  }
   0xa   :  { %s1532_s8 = smov [#allocation4]   ;;  %s1464_s9 = scalar_lea.vmem %s17_s29, 16 }
   0xb   :  { %15 = dma.vmem_to_smem %s13_s26, 16, %s1532_s8, [#allocation3] }
   0xc   :  { %p1465_p5 = scmp.ne.s32.totalorder %s17_s29, %s1464_s9  ;;  %p1469_p6 = scmp.lt.s32.totalorder %s17_s29, %s17_s29 }
   0xd   :  { %p1470_p7 = scmp.lt.s32.totalorder %s1464_s9, %s1464_s9 }
   0xf   :  { %p1471_p8 = por %p1470_p7, %p1469_p6 }
  0x11   :  { %p1472_p9 = pnand %p1471_p8, %p1465_p5 }
  0x13   :  { %1475 = shalt.err (!%p1472_p9)  }
  0x14   :  { %s1533_s0 = smov [#allocation5]  }
  0x15   :  { %19 = dma.vmem_to_smem %s17_s29, 16, %s1533_s0, [#allocation3] }
  0x16   :  { %1514 = dma.done.wait [#allocation3], 32 }
  0x17   :  { %1515 = vsyncadd [#allocation3], 4294967264 }
  0x18   :  { %21 = sfence }
  0x19   :  { %22 = vsyncpa [#allocation7], 0  ;;  %s1585_s1 = smov 0   ;;  %s1587_s10 = smov 0  }
  0x1a   :  { %s1589_s11 = smov 0  }
  0x1b LB: > { %s1204_s12 = sadd.s32 4294967295, %s1530_s11   ;;  %s43_s13 = sadd.s32 1, %s1526_s10  ;;  %s1530_s11 = sphi %s1589_s11, %s28_s11   ;;  %s1526_s10 = sphi %s1587_s10, %s1765_s10   ;;  %s1522_s1 = sphi %s1585_s1, %s1764_s1  }
  0x1c   : > { %p45_p10 = scmp.ge.s32.totalorder %s43_s13, 8  ;;  %p1216_p11 = scmp.ge.s32.totalorder %s1530_s11, 1 }
  0x1d   : > { %p450_p12 = scmp.lt.s32.totalorder %s1530_s11, 9 }
  0x1e   : > { %s1767_s13 = smov (%p45_p10, %s43_s13), 0 }
  0x1f   : > { %p451_p13 = pnand %p1216_p11, %p450_p12 }
  0x20   : > { %s555_s14 = sshra.s32 (!%p451_p13), %s1522_s1, 7  ;;  %s560_s15 = sand.u32 (!%p451_p13), 127, %s1522_s1 }
  0x21   : > { %454 = sbr.rel (%p451_p13) target bundleno = 599 (0x257), region = 40  ;;  %s1217_s16 = sshll.u32 (!%p451_p13), %s555_s14, 7 }
  0x22   : > { %p676_p0 = scmp.eq.s32.totalorder (!%p451_p13), %s1522_s1, 0  ;;  %s1609_s17 = sadd.s32 (!%p451_p13), %s1217_s16, %s560_s15 }
  0x23   : > { %s563_s18 = sld [smem:[#allocation5 + %s1609_s17]] (!%p451_p13) }
  0x24   : > { %s592_s19 = sld [smem:[#allocation4 + %s1609_s17]] (!%p451_p13) }
  0x25   : > { %s593_s20 = sld [smem:[#allocation5 + %s1609_s17]] (!%p451_p13) }
  0x26   : > { %s629_s21 = sld [smem:[#allocation5 + %s1609_s17]] (!%p451_p13) }
  0x27   : > { %s656_s22 = sld [smem:[#allocation5 + %s1609_s17]] (!%p451_p13) }
  0x28   : > { %vm682_vm0 = vcmask (%p676_p0), 261120   ;;  %v1534_v0 = vmov (%p676_p0), 0.0  }
  0x29   : > { %p566_p1 = scmp.lt.s32.totalorder %s563_s18, 7  ;;  %683 = vst.msk [vmem:[#allocation2] sm:$0xff] (%p676_p0), %vm682_vm0, %v1534_v0  ;;  %684 = vst.msk [vmem:[#allocation2 + $0x8] sm:$0xff] (%p676_p0), %vm682_vm0, %v1534_v0 }
  0x2a   : > { %s596_s23 = ssub.s32 1, %s592_s19 }
  0x2b   : > { %s597_s24 = sadd.s32 %s596_s23, %s592_s19  ;;  %p599_p2 = scmp.lt.s32.totalorder %s593_s20, 7 }
  0x2c   : > { %s1769_s18 = smov (!%p566_p1, %s563_s18), 7  ;;  %s1221_s25 = sshll.u32 %s597_s24, 3 }
  0x2d   : > { %s1266_s26 = sshll.u32 %s1769_s18, 7  ;;  %p601_p3 = scmp.lt.s32.totalorder %s1221_s25, 15 }
  0x2e   : > { %s1619_s29 = scalar_lea.vmem %s1755_s3, %s1266_s26  ;;  %s1771_s20 = smov (!%p599_p2, %s593_s20), 7 }
  0x2f   : > { %s1773_s25 = smov (!%p601_p3, %s1221_s25), 15  ;;  %s1222_s30 = sshll.u32 %s1771_s20, 4 }
  0x30   : > { %p631_p4 = scmp.lt.s32.totalorder %s629_s21, 7  ;;  %s604_s8 = sadd.s32 %s1222_s30, %s1773_s25 }
  0x31   : > { %p658_p5 = scmp.lt.s32.totalorder %s656_s22, 7  ;;  %s1223_s9 = sshll.u32 %s604_s8, 3 }
  0x32   : > { %s1624_s15 = scalar_lea.vmem %s1756_s4, %s1223_s9  ;;  %s1775_s21 = smov (!%p631_p4, %s629_s21), 7 }
  0x33   : > { %s1777_s22 = smov (!%p658_p5, %s656_s22), 7  ;;  %s1267_s16 = sshll.u32 %s1775_s21, 5 }
  0x34   : > { %s1629_s23 = scalar_lea.vmem %s1757_s5, %s1267_s16  ;;  %s1268_s24 = sshll.u32 %s1777_s22, 4 }
  0x35   : > { %s1634_s25 = scalar_lea.vmem %s1758_s6, %s1268_s24  ;;  %681 = sbr.rel (!%p676_p0) target bundleno = 60 (0x3c), region = 44 }
  0x3c PF: > { %s692_s21 = sld [smem:[#allocation4 + %s1609_s17]] }
  0x42   : > { %p1232_p6 = scmp.le.s32.totalorder %s692_s21, 0 }
  0x43   : > { %v699_v1 = vld [vmem:[%s1619_s29] sm:$0xff] (!%p1232_p6)  ;;  %v700_v2 = vld [vmem:[%s1619_s29 + $0x8] sm:$0xff] (!%p1232_p6)  ;;  %vm707_vm1 = vcmask (!%p1232_p6), 261120   ;;  %v701_v3 = vld [vmem:[%s1619_s29 + $0x10] sm:$0xff] (!%p1232_p6)  ;;  %v1535_v7 = vmov (!%p1232_p6), 0   ;;  %vm954_vm3 = vcmask (!%p1232_p6), 523264  }
  0x44   : > { %696 = sbr.rel (%p1232_p6) target bundleno = 564 (0x234), region = 48  ;;  %v1346_v4 = vpack.c.bf16 (!%p1232_p6), %v700_v2, %v699_v1  ;;  %vm1644_vm2 = vmpackc.low (!%p1232_p6), %vm707_vm1, %vm707_vm1  ;;  %v702_v6 = vld [vmem:[%s1619_s29 + $0x18] sm:$0xff] (!%p1232_p6)  ;;  %1443 = vset.pattern.permute.xlu0 (!%p1232_p6), %v1535_v7  ;;  %v813_v9 = vld [vmem:[%s1624_s15] sm:$0xff] (!%p1232_p6) }
  0x45   : > { %v1352_v8 = vpack.c.bf16 (!%p1232_p6), %v702_v6, %v701_v3  ;;  %v814_v10 = vld [vmem:[%s1624_s15 + $0x8] sm:$0xff] (!%p1232_p6)  ;;  %v697_v11 = vld [vmem:[%s1754_s2] sm:$0xff] (!%p1232_p6)  ;;  %v815_v13 = vld [vmem:[%s1624_s15 + $0x10] sm:$0xff] (!%p1232_p6) }
  0x46   : > { %1348 = vmatprep.subr.msk.bf16.mxu0 (!%p1232_p6), %vm1644_vm2, %v1346_v4  ;;  %v1370_v12 = vpack.c.bf16 (!%p1232_p6), %v814_v10, %v813_v9  ;;  %1313 = vmatprep.mubr.msk.f32.mxu0 (!%p1232_p6), %vm707_vm1, %v697_v11  ;;  %v816_v14 = vld [vmem:[%s1624_s15 + $0x18] sm:$0xff] (!%p1232_p6)  ;;  %v703_v16 = vld [vmem:[%s1619_s29 + $0x20] sm:$0xff] (!%p1232_p6)  ;;  %v704_v17 = vld [vmem:[%s1619_s29 + $0x28] sm:$0xff] (!%p1232_p6) }
  0x47   : > { %1351 = vmatpush3.bf16.xpose.msk.msra.mxu0 (!%p1232_p6), %vm1644_vm2, %v1346_v4  ;;  %v1376_v15 = vpack.c.bf16 (!%p1232_p6), %v816_v14, %v815_v13  ;;  %1332 = vmatprep.mubr.msk.f32.mxu1 (!%p1232_p6), %vm707_vm1, %v697_v11  ;;  %v936_v18 = vld [vmem:[%s1634_s25] sm:$0xff] (!%p1232_p6)  ;;  %v937_v19 = vld [vmem:[%s1634_s25 + $0x8] sm:$0xff] (!%p1232_p6)  ;;  %v1358_v20 = vpack.c.bf16 (!%p1232_p6), %v704_v17, %v703_v16  ;;  %v705_v24 = vld [vmem:[%s1619_s29 + $0x30] sm:$0xff] (!%p1232_p6) }
  0x48   : > { %1354 = vmatprep.subr.msk.bf16.mxu0 (!%p1232_p6), %vm1644_vm2, %v1352_v8  ;;  %1372 = vmatprep.subr.msk.bf16.mxu1 (!%p1232_p6), %vm1644_vm2, %v1370_v12  ;;  %v817_v21 = vld [vmem:[%s1624_s15 + $0x20] sm:$0xff] (!%p1232_p6)  ;;  %v818_v22 = vld [vmem:[%s1624_s15 + $0x28] sm:$0xff] (!%p1232_p6)  ;;  %v706_v25 = vld [vmem:[%s1619_s29 + $0x38] sm:$0xff] (!%p1232_p6) }
  0x49   : > { %1375 = vmatpush3.bf16.xpose.msk.msra.mxu1 (!%p1232_p6), %vm1644_vm2, %v1370_v12  ;;  %940 = vperm.xlu0 (!%p1232_p6), %1443, %v936_v18   ;;  %v1382_v23 = vpack.c.bf16 (!%p1232_p6), %v818_v22, %v817_v21  ;;  %v1364_v26 = vpack.c.bf16 (!%p1232_p6), %v706_v25, %v705_v24  ;;  %v819_v27 = vld [vmem:[%s1624_s15 + $0x30] sm:$0xff] (!%p1232_p6)  ;;  %v820_v28 = vld [vmem:[%s1624_s15 + $0x38] sm:$0xff] (!%p1232_p6)  ;;  %v698_v30 = vld [vmem:[%s1754_s2 + $0x8] sm:$0xff] (!%p1232_p6) }
  0x4a   : > { %1378 = vmatprep.subr.msk.bf16.mxu1 (!%p1232_p6), %vm1644_vm2, %v1376_v15  ;;  %v1388_v29 = vpack.c.bf16 (!%p1232_p6), %v820_v28, %v819_v27  ;;  %v950_v31 = vld [vmem:[%s1629_s23] sm:$0xff] (!%p1232_p6)  ;;  %v951_v32 = vld [vmem:[%s1629_s23 + $0x8] sm:$0xff] (!%p1232_p6)  ;;  %vm1395_vm4 = vmpackc.low (!%p1232_p6), %vm954_vm3, %vm954_vm3 }
  0x4b   : > { %v1394_v33 = vpack.c.bf16 %v951_v32, %v950_v31  ;;  %v952_v34 = vld [vmem:[%s1629_s23 + $0x10] sm:$0xff]  ;;  %v953_v35 = vld [vmem:[%s1629_s23 + $0x18] sm:$0xff]  ;;  %v1048_v58 = vld [vmem:[#allocation2] sm:$0xff] }
  0x4c   : > { %v1400_v36 = vpack.c.bf16 %v953_v35, %v952_v34  ;;  %v1049_v57 = vld [vmem:[#allocation2 + $0x8] sm:$0xff] }
  0x4d   : > { %945 = vperm.xlu0 %1443, %v937_v19  }
  0x4f   : > { %1357 = vmatpush3.bf16.xpose.msk.msra.mxu0 %vm1644_vm2, %v1352_v8 }
  0x50   : > { %1360 = vmatprep.subr.msk.bf16.mxu0 %vm1644_vm2, %v1358_v20 }
  0x51   : > { %1381 = vmatpush3.bf16.xpose.msk.msra.mxu1 %vm1644_vm2, %v1376_v15 }
  0x52   : > { %1384 = vmatprep.subr.msk.bf16.mxu1 %vm1644_vm2, %v1382_v23 }
  0x57   : > { %1363 = vmatpush3.bf16.xpose.msk.msra.mxu0 %vm1644_vm2, %v1358_v20 }
  0x58   : > { %1366 = vmatprep.subr.msk.bf16.mxu0 %vm1644_vm2, %v1364_v26 }
  0x59   : > { %1387 = vmatpush3.bf16.xpose.msk.msra.mxu1 %vm1644_vm2, %v1382_v23 }
  0x5a   : > { %1390 = vmatprep.subr.msk.bf16.mxu1 %vm1644_vm2, %v1388_v29 }
  0x5f   : > { %1369 = vmatpush3.bf16.xpose.msk.msra.mxu0 %vm1644_vm2, %v1364_v26 }
  0x60   : > { %1396 = vmatprep.subr.msk.bf16.mxu0 %vm1395_vm4, %v1394_v33 }
  0x61   : > { %1393 = vmatpush3.bf16.xpose.msk.msra.mxu1 %vm1644_vm2, %v1388_v29 }
  0x66   : > { %1314 = vmatmul.mubr.msk.f32.vlgmr.msra.gmra.mrb[0].mxu0 %vm707_vm1, %v698_v30 }
  0x67   : > { %1399 = vmatpush3.bf16.xpose.msk.msra.mxu0 %vm1395_vm4, %v1394_v33 }
  0x68   : > { %1333 = vmatmul.mubr.msk.f32.vlgmr.msra.gmra.mrb[0].mxu1 %vm707_vm1, %v698_v30  ;;  %1402 = vmatprep.subr.msk.bf16.mxu0 %vm1395_vm4, %v1400_v36 }
  0x6f   : > { %1405 = vmatpush3.bf16.xpose.msk.msra.mxu0 %vm1395_vm4, %v1400_v36 }
  0xc8   : > { %v941_v48 = vpop.permute.xlu0 %940 }
  0xcc   : > { %v946_v54 = vpop.permute.xlu0 %945 }
 0x139   : > { %v1315_v37 = vpop.f32.mrb[0].mxu0 }
 0x13a   : > { %v1254_v38 = vmul.f32 -1.442695, %v1315_v37  ;;  %v804_v39 = vpop.f32.mrb[1].mxu0 }
 0x13b   : > { %v1253_v40 = vmul.f32 -1.442695, %v804_v39  ;;  %v1334_v41 = vpop.f32.mrb[0].mxu1 }
 0x13c   : > { %1444 = vpow2.f32 %v1254_v38  ;;  %v911_v42 = vpop.f32.mrb[1].mxu1 }
 0x13d   : > { %1446 = vpow2.f32 %v1253_v40 }
 0x146   : > { %v1445_v43 = vpop.eup %1444 }
 0x147   : > { %v1447_v44 = vpop.eup %1446  ;;  %v927_v45 = vadd.f32 1.0, %v1445_v43 }
 0x148   : > { %v926_v46 = vadd.f32 1.0, %v1447_v44 }
 0x149   : > { %1448 = vrcp.f32 %v927_v45 }
 0x14a   : > { %1450 = vrcp.f32 %v926_v46 }
 0x153   : > { %v1449_v47 = vpop.eup %1448 }
 0x154   : > { %v1451_v49 = vpop.eup %1450  ;;  %v933_v50 = vmul.f32 %v1449_v47, %v1315_v37 }
 0x155   : > { %v932_v51 = vmul.f32 %v1451_v49, %v804_v39 }
 0x156   : > { %v935_v52 = vmul.f32 %v1334_v41, %v933_v50 }
 0x157   : > { %v934_v53 = vmul.f32 %v932_v51, %v911_v42 }
 0x158   : > { %v949_v56 = vmul.f32 %v946_v54, %v935_v52 }
 0x159   : > { %v948_v55 = vmul.f32 %v941_v48, %v934_v53 }
 0x15b   : > { %1343 = vmatprep.mubr.msk.f32.mxu0 %vm954_vm3, %v948_v55 }
 0x15c   : > { %1344 = vmatmul.mubr.msk.f32.vlgmr.msra.gmra.mrb[2].mxu0 %vm954_vm3, %v949_v56 }
 0x22f   : > { %v1345_v59 = vpop.f32.mrb[2].mxu0 }
 0x230   : > { %v1051_v60 = vadd.f32 %v1345_v59, %v1049_v57  ;;  %v1039_v61 = vpop.f32.mrb[3].mxu0 }
 0x231   : > { %v1050_v62 = vadd.f32 %v1048_v58, %v1039_v61 }
 0x232   : > { %1053 = vst.msk [vmem:[#allocation2 + $0x8] sm:$0xff] %vm707_vm1, %v1051_v60 }
 0x233   : > { %1052 = vst.msk [vmem:[#allocation2] sm:$0xff] %vm707_vm1, %v1050_v62 }
 0x234 PF: > { %p1054_p7 = scmp.eq.s32.totalorder %s1522_s1, 7 }
 0x235   : > { %vm1061_vm5 = vcmask (%p1054_p7), 261120  }
 0x236   : > { %1058 = sbr.rel (!%p1054_p7) target bundleno = 573 (0x23d), region = 52 }
 0x239   : > { %v1060_v0 = vld [vmem:[#allocation2 + $0x8] sm:$0xff] (%p1054_p7) }
 0x23a   : > { %v1059_v63 = vld [vmem:[#allocation2] sm:$0xff] (%p1054_p7)  ;;  %1063 = vst.msk [vmem:[#allocation6 + $0x8] sm:$0xff] (%p1054_p7), %vm1061_vm5, %v1060_v0 }
 0x23b   : > { %1062 = vst.msk [vmem:[#allocation6] sm:$0xff] (%p1054_p7), %vm1061_vm5, %v1059_v63 }
 0x23d PF: > { %p1718_p8 = scmp.eq.s32.totalorder %s1204_s12, 7  ;;  %s1536_s30 = smov [#allocation6]  }
 0x23e   : > { %s1073_s8 = sshll.u32 %s1536_s30, 4  ;;  %s1074_s8 = int_to_ptr.vmem [resolvable:$true] %s1073_s8 }
 0x23f   : > { %s1476_s9 = scalar_lea.vmem %s1074_s8, 256  ;;  %p1483_p12 = scmp.lt.s32.totalorder %s1074_s8, %s1074_s8 }
 0x240   : > { %p1477_p9 = scmp.ne.s32.totalorder %s1074_s8, %s1476_s9  ;;  %p1484_p13 = scmp.lt.s32.totalorder %s1476_s9, %s1476_s9 }
 0x242   : > { %p1478_p10 = pnand %p1477_p9, %p1718_p8  ;;  %p1485_p0 = por %p1484_p13, %p1483_p12 }
 0x244   : > { %p1479_p11 = pneg %p1478_p10 }
 0x246   : > { %p1486_p1 = pnand %p1485_p0, %p1479_p11 }
 0x248   : > { %1489 = shalt.err (!%p1486_p1)
}
 0x249   : > { %s1490_s12 = scalar_lea.hbm %s1759_s7, 256 }
 0x24a   : > { %p1491_p2 = scmp.ne.s32.totalorder %s1759_s7, %s1490_s12  ;;  %p1496_p5 = scmp.lt.u32.totalorder %s1490_s12, %s1759_s7 }
 0x24c   : > { %p1492_p3 = pnand %p1491_p2, %p1718_p8 }
 0x24e   : > { %p1493_p4 = pneg %p1492_p3 }
 0x250   : > { %p1498_p6 = pnand %p1496_p5, %p1493_p4 }
 0x252   : > { %1501 = shalt.err (!%p1498_p6)
}
 0x253   : > { %s1537_s19 = smov 128   ;;  %s1538_s23 = smov 8  }
 0x254   : > { %1407 = dma.vmem_to_hbm [thread:$0]  (%p1718_p8), %s1074_s8, 256, %s1759_s7, [#allocation7], %s1537_s19, %s1537_s19, %s1538_s23  }
 0x255   : > { %1517 = dma.done.wait (%p1718_p8), [#allocation7], 256  }
 0x256   : > { %1519 = vsyncadd (%p1718_p8), [#allocation7], 4294967040 }
 0x257 PF: > { %s28_s11 = sadd.s32 1, %s1530_s11   ;;  %s1764_s1 = smov %s1526_s10 }
 0x258   : > { %p25_p7 = scmp.ge.s32.totalorder %s28_s11, 10   ;;  %s1765_s10 = smov %s1767_s13 }
 0x25a   :  { %27 = sbr.rel (!%p25_p7) target bundleno = 27 (0x1b), region = 92 }
 0x261   :  { %1089 = vsyncpa [#allocation7], 1 }
 0x262   :  { %1091 = vsyncpa [#allocation7 + $0x1], 1 }

</bundles_post_ra>
